<compile_context>
chip_gen: v7x
topology: tpu7x:2x2x1
jax: 0.10.0
libtpu: 0.0.40
codegen_flags: <defaults>
</compile_context>

<pallas_src>
import jax
import jax.numpy as jnp
import numpy as np
from jax.experimental import pallas as pl
from jax.experimental.pallas import tpu as pltpu

LANE = 128      # TPU lane width
ROW_ALIGN = 16  # bf16 packs 2 rows/sublane -> align M tiles to 16


def _round_up(x, m):
    return (x + m - 1) // m * m


def _pick_tm(M, tm):
    """Pick an M tile: 16-aligned (bf16 packing), <= requested, and keep >=2
    grid steps when there is enough work so both v7x TensorCores are used."""
    M16 = _round_up(M, ROW_ALIGN)
    tm = _round_up(min(tm, M16), ROW_ALIGN)
    if M16 >= 2 * ROW_ALIGN and _round_up(M16, tm) // tm < 2:
        tm = _round_up(M16 // 2, ROW_ALIGN)
    return tm


def _patch_proj_kernel(p_ref, w_ref, b_ref, o_ref):
    # p_ref: (TM, K) bf16 patches tile
    # w_ref: (K, N)  bf16 projection weight (constant across grid steps)
    # b_ref: (1, N)  f32 bias (constant across grid steps)
    # o_ref: (TM, N) output tile
    acc = jnp.dot(p_ref[...], w_ref[...], preferred_element_type=jnp.float32)
    o_ref[...] = (acc + b_ref[...]).astype(o_ref.dtype)


def _patch_proj(patches, weight, bias, *, out_dtype, tm=512):
    """patches: (M, K) bf16, weight: (K, N) bf16, bias: (N,) f32.

    Returns the padded (M_pad, N) result; callers slice lazily so the slice
    fuses into whatever reshape/transpose follows.
    """
    M, K = patches.shape
    Kw, N = weight.shape
    assert K == Kw, (K, Kw)

    tm = _pick_tm(M, tm)
    M_pad = _round_up(M, tm)
    if M_pad != M:
        # Pad rows instead of asserting divisibility; the pad fuses with the
        # upstream patch-extraction fusion.
        patches = jnp.pad(patches, ((0, M_pad - M), (0, 0)))

    bias2d = bias.reshape(1, N).astype(jnp.float32)
    grid = (M_pad // tm,)
    out_itemsize = np.dtype(out_dtype).itemsize

    cost = pl.CostEstimate(
        flops=2 * M_pad * K * N,
        transcendentals=0,
        bytes_accessed=(M_pad * K * patches.dtype.itemsize
                        + K * N * weight.dtype.itemsize
                        + M_pad * N * out_itemsize
                        + N * 4),
    )

    # Worst-case VMEM (everything double-buffered).  Explicit limit so large
    # tiles also compile under v5e's 16 MiB scoped default; cap at 64 MiB so
    # we never ask for more than v7x physically has.
    vmem_need = (2 * K * N * 2          # weight
                 + 2 * N * 4            # bias
                 + 2 * tm * K * 2       # patches tile
                 + 2 * tm * N * out_itemsize)  # output tile
    vmem_limit = int(min(max(2 * vmem_need, 32 << 20), 64 << 20))

    def run(single_buffer_consts):
        const_kw = {}
        if single_buffer_consts:
            # Constant index_map -> never re-fetched; single-buffer to save VMEM.
            const_kw = dict(pipeline_mode=pl.Buffered(1))
        in_specs = [
            pl.BlockSpec((tm, K), lambda i: (i, 0)),              # patches tile
            pl.BlockSpec((K, N), lambda i: (0, 0), **const_kw),   # resident weight
            pl.BlockSpec((1, N), lambda i: (0, 0), **const_kw),   # resident bias
        ]
        return pl.pallas_call(
            _patch_proj_kernel,
            out_shape=jax.ShapeDtypeStruct((M_pad, N), out_dtype),
            grid_spec=pltpu.PrefetchScalarGridSpec(
                num_scalar_prefetch=0,
                grid=grid,
                in_specs=in_specs,
                out_specs=pl.BlockSpec((tm, N), lambda i: (i, 0)),
            ),
            compiler_params=pltpu.CompilerParams(
                dimension_semantics=("parallel",),
                vmem_limit_bytes=vmem_limit,
            ),
            cost_estimate=cost,
        )(patches, weight, bias2d)

    if hasattr(pl, "Buffered"):
        try:
            return run(True)
        except Exception:
            # Older Pallas without pipeline_mode / Buffered(1) support.
            return run(False)
    return run(False)


def patch_embed2_forward(x, weight, bias, patch_size, *,
                         channels_last=False, out_dtype=jnp.bfloat16, tm=512):
    """PatchEmbed2.forward.

    x:      (B, C, H, W)                 NCHW, like PyTorch
    weight: (embed_dim, C, p, p)         nn.Conv2d weight layout
    bias:   (embed_dim,)
    returns (B, embed_dim, H//p, W//p)   NCHW (PyTorch semantics), or
            (B, H//p, W//p, embed_dim)   if channels_last=True (skips one HBM pass)

    Note: matmul operands are bf16 with f32 accumulation; out_dtype defaults
    to bf16 (the op is HBM-bound — the f32 store dominates traffic).  Pass
    out_dtype=jnp.float32 for an f32-typed output.
    """
    B, C, H, W = x.shape
    p = patch_size
    assert H % p == 0 and W % p == 0, "Input image size must match model."
    Hp, Wp = H // p, W // p
    E = weight.shape[0]
    K = C * p * p
    M = B * Hp * Wp

    K_pad = _round_up(K, LANE)
    N_pad = _round_up(E, LANE)

    # --- layout glue (XLA): extract non-overlapping patches in bf16 ---
    # (B, C, Hp, p, Wp, p) -> (B, Hp, Wp, C, p, p) -> (M, K); the bf16 convert
    # fuses into the transpose so this pass runs at half width.
    xp = x.reshape(B, C, Hp, p, Wp, p)
    xp = jnp.transpose(xp, (0, 2, 4, 1, 3, 5))
    patches = xp.reshape(M, K).astype(jnp.bfloat16)
    if K_pad != K:
        patches = jnp.pad(patches, ((0, 0), (0, K_pad - K)))

    # conv weight (E, C, p, p) -> dense (K, E), bf16, zero-padded to lane
    # multiples; contraction order matches the (C, p, p) patch flattening.
    w2d = weight.reshape(E, K).T.astype(jnp.bfloat16)
    b1d = bias.astype(jnp.float32)
    if K_pad != K or N_pad != E:
        w2d = jnp.pad(w2d, ((0, K_pad - K), (0, N_pad - E)))
        b1d = jnp.pad(b1d, (0, N_pad - E))

    # --- hot path: bf16 projection matmul + f32 bias in Pallas ---
    out = _patch_proj(patches, w2d, b1d, out_dtype=out_dtype, tm=tm)
    # Lazy slice of padded rows/cols; fuses into the reshape / transpose below.
    out = out[:M, :E].reshape(B, Hp, Wp, E)

    if channels_last:
        return out
    # NCHW to match nn.Conv2d output (an extra HBM pass, but now in bf16 by
    # default; prefer channels_last=True downstream if the consumer allows it).
    return jnp.transpose(out, (0, 3, 1, 2))


def _reference_conv(x, weight, bias, p):
    E = weight.shape[0]
    return jax.lax.conv_general_dilated(
        x, weight, window_strides=(p, p), padding="VALID",
        dimension_numbers=("NCHW", "OIHW", "NCHW"),
    ) + bias.reshape(1, E, 1, 1)


if __name__ == "__main__":
    key = jax.random.PRNGKey(0)
    k1, k2, k3, k4, k5, k6 = jax.random.split(key, 6)

    # --- check 1: small shapes consistent with the module (bf16 output) ---
    B, C, H, W, p, E = 2, 4, 16, 16, 4, 32
    x = jax.random.normal(k1, (B, C, H, W), dtype=jnp.float32)
    weight = jax.random.normal(k2, (E, C, p, p), dtype=jnp.float32) * 0.02
    bias = jax.random.normal(k3, (E,), dtype=jnp.float32) * 0.02

    out = jax.block_until_ready(patch_embed2_forward(x, weight, bias, p))
    assert out.shape == (B, E, H // p, W // p), out.shape
    ref = _reference_conv(x, weight, bias, p)
    # bf16 operands/output with f32 accumulation -> loose-ish tolerance.
    err = float(jnp.max(jnp.abs(out.astype(jnp.float32) - ref)))
    assert err < 2e-2, err

    # --- check 2: exercises M/K/N padding, multi-row grid logic, f32 output ---
    B2, C2, H2, W2, p2, E2 = 1, 3, 20, 20, 4, 40
    x2 = jax.random.normal(k4, (B2, C2, H2, W2), dtype=jnp.float32)
    w2 = jax.random.normal(k5, (E2, C2, p2, p2), dtype=jnp.float32) * 0.02
    b2 = jax.random.normal(k6, (E2,), dtype=jnp.float32) * 0.02

    out2 = jax.block_until_ready(
        patch_embed2_forward(x2, w2, b2, p2, out_dtype=jnp.float32))
    assert out2.shape == (B2, E2, H2 // p2, W2 // p2), out2.shape
    ref2 = _reference_conv(x2, w2, b2, p2)
    err2 = float(jnp.max(jnp.abs(out2 - ref2)))
    assert err2 < 2e-2, err2

    print("KERNEL_OK")
</pallas_src>

<mosaic_0001>
module attributes {stable_mosaic.version = 11 : i64} {
  func.func @_patch_proj_kernel(%arg0: i32, %arg1: memref<16x128xbf16, #tpu.memory_space<vmem>>, %arg2: memref<128x128xbf16, #tpu.memory_space<vmem>>, %arg3: memref<1x128xf32, #tpu.memory_space<vmem>>, %arg4: memref<16x128xbf16, #tpu.memory_space<vmem>>) attributes {dimension_semantics = [#tpu.dimension_semantics<parallel>], iteration_bounds = array<i64: 2>, scalar_prefetch = 0 : i64, scratch_operands = 0 : i64, tpu.core_type = #tpu.core_type<tc>, window_params = [{transform_indices = @transform_0, window_bounds = array<i64: 16, 128>}, {pipeline_mode = #tpu.pipeline_mode<synchronous>, transform_indices = @transform_1, window_bounds = array<i64: 128, 128>}, {pipeline_mode = #tpu.pipeline_mode<synchronous>, transform_indices = @transform_2, window_bounds = array<i64: 1, 128>}, {transform_indices = @transform_3, window_bounds = array<i64: 16, 128>}]} {
    %c0 = arith.constant 0 : index
    %c0_0 = arith.constant 0 : index
    %0 = vector.load %arg1[%c0, %c0_0] : memref<16x128xbf16, #tpu.memory_space<vmem>>, vector<16x128xbf16>
    %c0_1 = arith.constant 0 : index
    %c0_2 = arith.constant 0 : index
    %1 = vector.load %arg2[%c0_1, %c0_2] : memref<128x128xbf16, #tpu.memory_space<vmem>>, vector<128x128xbf16>
    %cst = arith.constant dense<0.000000e+00> : vector<16x128xf32>
    %2 = tpu.matmul %0, %1, %cst {dimension_numbers = #tpu.dot_dimension_numbers<[1], [0], [0], [1], [0, 0, 1, 1], [], []>} : vector<16x128xbf16>, vector<128x128xbf16>, vector<16x128xf32> -> vector<16x128xf32>
    %c0_3 = arith.constant 0 : index
    %c0_4 = arith.constant 0 : index
    %3 = vector.load %arg3[%c0_3, %c0_4] : memref<1x128xf32, #tpu.memory_space<vmem>>, vector<1x128xf32>
    %4 = vector.broadcast %3 : vector<1x128xf32> to vector<16x128xf32>
    %5 = arith.addf %2, %4 : vector<16x128xf32>
    %6 = arith.truncf %5 : vector<16x128xf32> to vector<16x128xbf16>
    %c0_5 = arith.constant 0 : index
    %c0_6 = arith.constant 0 : index
    %7 = vector.load %arg4[%c0_5, %c0_6] : memref<16x128xbf16, #tpu.memory_space<vmem>>, vector<16x128xbf16>
    tpu.vector_store %arg4[%c0_5, %c0_6], %6 {strides = array<i32>} : memref<16x128xbf16, #tpu.memory_space<vmem>>, vector<16x128xbf16>,
    return
  }
  func.func @transform_0(%arg0: i32) -> (i32, i32) {
    %c0_i32 = arith.constant 0 : i32
    %c0_i32_0 = arith.constant 0 : i32
    return %arg0, %c0_i32 : i32, i32
  }
  func.func @transform_1(%arg0: i32) -> (i32, i32) {
    %c0_i32 = arith.constant 0 : i32
    %c0_i32_0 = arith.constant 0 : i32
    %c0_i32_1 = arith.constant 0 : i32
    return %c0_i32, %c0_i32_0 : i32, i32
  }
  func.func @transform_2(%arg0: i32) -> (i32, i32) {
    %c0_i32 = arith.constant 0 : i32
    %c0_i32_0 = arith.constant 0 : i32
    %c0_i32_1 = arith.constant 0 : i32
    return %c0_i32, %c0_i32_0 : i32, i32
  }
  func.func @transform_3(%arg0: i32) -> (i32, i32) {
    %c0_i32 = arith.constant 0 : i32
    %c0_i32_0 = arith.constant 0 : i32
    return %arg0, %c0_i32 : i32, i32
  }
}

module attributes {stable_mosaic.version = 11 : i64} {
  func.func @_patch_proj_kernel(%arg0: i32, %arg1: memref<16x128xbf16, #tpu.memory_space<vmem>>, %arg2: memref<128x128xbf16, #tpu.memory_space<vmem>>, %arg3: memref<1x128xf32, #tpu.memory_space<vmem>>, %arg4: memref<16x128xbf16, #tpu.memory_space<vmem>>) attributes {dimension_semantics = [#tpu.dimension_semantics<parallel>], iteration_bounds = array<i64: 2>, scalar_prefetch = 0 : i64, scratch_operands = 0 : i64, tpu.core_type = #tpu.core_type<tc>, window_params = [{transform_indices = @transform_0, window_bounds = array<i64: 16, 128>}, {pipeline_mode = #tpu.pipeline_mode<synchronous>, transform_indices = @transform_1, window_bounds = array<i64: 128, 128>}, {pipeline_mode = #tpu.pipeline_mode<synchronous>, transform_indices = @transform_2, window_bounds = array<i64: 1, 128>}, {transform_indices = @transform_3, window_bounds = array<i64: 16, 128>}]} {
    %c0 = arith.constant 0 : index
    %c0_0 = arith.constant 0 : index
    %0 = vector.load %arg1[%c0, %c0_0] : memref<16x128xbf16, #tpu.memory_space<vmem>>, vector<16x128xbf16>
    %c0_1 = arith.constant 0 : index
    %c0_2 = arith.constant 0 : index
    %1 = vector.load %arg2[%c0_1, %c0_2] : memref<128x128xbf16, #tpu.memory_space<vmem>>, vector<128x128xbf16>
    %cst = arith.constant dense<0.000000e+00> : vector<16x128xf32>
    %2 = tpu.matmul %0, %1, %cst {dimension_numbers = #tpu.dot_dimension_numbers<[1], [0], [0], [1], [0, 0, 1, 1], [], []>} : vector<16x128xbf16>, vector<128x128xbf16>, vector<16x128xf32> -> vector<16x128xf32>
    %c0_3 = arith.constant 0 : index
    %c0_4 = arith.constant 0 : index
    %3 = vector.load %arg3[%c0_3, %c0_4] : memref<1x128xf32, #tpu.memory_space<vmem>>, vector<1x128xf32>
    %4 = vector.broadcast %3 : vector<1x128xf32> to vector<16x128xf32>
    %5 = arith.addf %2, %4 : vector<16x128xf32>
    %6 = arith.truncf %5 : vector<16x128xf32> to vector<16x128xbf16>
    %c0_5 = arith.constant 0 : index
    %c0_6 = arith.constant 0 : index
    %7 = vector.load %arg4[%c0_5, %c0_6] : memref<16x128xbf16, #tpu.memory_space<vmem>>, vector<16x128xbf16>
    tpu.vector_store %arg4[%c0_5, %c0_6], %6 {strides = array<i32>} : memref<16x128xbf16, #tpu.memory_space<vmem>>, vector<16x128xbf16>,
    return
  }
  func.func @transform_0(%arg0: i32) -> (i32, i32) {
    %c0_i32 = arith.constant 0 : i32
    %c0_i32_0 = arith.constant 0 : i32
    return %arg0, %c0_i32 : i32, i32
  }
  func.func @transform_1(%arg0: i32) -> (i32, i32) {
    %c0_i32 = arith.constant 0 : i32
    %c0_i32_0 = arith.constant 0 : i32
    %c0_i32_1 = arith.constant 0 : i32
    return %c0_i32, %c0_i32_0 : i32, i32
  }
  func.func @transform_2(%arg0: i32) -> (i32, i32) {
    %c0_i32 = arith.constant 0 : i32
    %c0_i32_0 = arith.constant 0 : i32
    %c0_i32_1 = arith.constant 0 : i32
    return %c0_i32, %c0_i32_0 : i32, i32
  }
  func.func @transform_3(%arg0: i32) -> (i32, i32) {
    %c0_i32 = arith.constant 0 : i32
    %c0_i32_0 = arith.constant 0 : i32
    return %arg0, %c0_i32 : i32, i32
  }
}

</mosaic_0001>

<bundles_post_ra>
// kernel: tpu_custom_call.1
= control target key start
LH: loop header
LB: loop body
LE: loop exit
PB: predicated region body
PF: predicated region fallthrough
CT: control target
= control target key end

     0   :  { %8 = vsyncpa [#allocation3], 0  ;;  %s948_s0 = inlined_call_operand.hbm [shape: bf16[32,128], index: 0, kind: input, shape index: {}]   ;;  %s949_s1 = inlined_call_operand.hbm [shape: bf16[128,128], index: 1, kind: input, shape index: {}]   ;;  %s950_s2 = inlined_call_operand.vmem [shape: f32[1,128], index: 2, kind: input, shape index: {}]   ;;  %s951_s3 = inlined_call_operand.hbm [shape: bf16[32,128], index: 3, kind: output, shape index: {}]  }
   0x1   :  { %10 = vsyncpa [#allocation3 + $0x1], 0 }
   0x2   :  { %11 = vsyncpa [#allocation6], 0 }
   0x3   :  { %12 = vsyncpa [#allocation4], 0 }
   0x4   :  { %14 = vsyncpa [#allocation4 + $0x1], 0  ;;  %s731_s12 = smov 0   ;;  %s733_s13 = smov 0  }
   0x5   :  { %s735_s14 = smov 0   ;;  %s737_s15 = smov 0  }
   0x6 LB: > { %s752_s16 = sadd.s32 4294967295, %s700_s15   ;;  %s434_s17 = sadd.s32 4294967294, %s700_s15   ;;  %s700_s15 = sphi %s737_s15, %s971_s15   ;;  %s696_s14 = sphi %s735_s14, %s970_s14   ;;  %s692_s13 = sphi %s733_s13, %s969_s13   ;;  %s688_s12 = sphi %s731_s12, %s968_s12  }
   0x7   : > { %p40_p0 = scmp.ne.s32.totalorder %s692_s13, %s688_s12  ;;  %p952_p1 = scmp.eq.s32.totalorder %s752_s16, 0 }
   0x8   : > { %p112_p3 = scmp.eq.s32.totalorder %s434_s17, 1  ;;  %p435_p5 = scmp.ge.s32.totalorder %s700_s15, 1 }
   0x9   : > { %p761_p4 = por %p952_p1, %p40_p0  ;;  %p119_p7 = scmp.lt.s32.totalorder %s700_s15, 3 }
   0xa   : > { %p766_p6 = por %p112_p3, %p40_p0  ;;  %s702_s21 = smov [#allocation5]  }
   0xb   : > { %s955_s18 = scalar_select %p761_p4, 1, 0 }
   0xc   : > { %s956_s19 = scalar_select %p766_p6, 1, 0 }
   0xd   : > { %p771_p8 = pnand %p435_p5, %p119_p7  ;;  %s131_s22 = sshll.u32 %s702_s21, 4  ;;  %s775_s22 = int_to_ptr.vmem [resolvable:$true] %s131_s22 }
   0xe   : > { %s787_s24 = sadd.s32 1, %s700_s15   ;;  %s27_s25 = sadd.s32 1, %s696_s14 }
   0xf   : > { %s957_s20 = scalar_select %p771_p8, 1, 0 }
  0x10   : > { %p508_p9 = pneg %p771_p8  ;;  %s24_s26 = ssub.s32 %s700_s15, %s787_s24 }
  0x11   : > { %s572_s29 = scalar_lea.hbm %s949_s1, 1024 }
  0x12   : > { %p782_p11 = pnand %p508_p9, %p952_p1  ;;  %p573_p12 = scmp.ne.s32.totalorder %s949_s1, %s572_s29 }
  0x13   : > { %p579_p5 = scmp.lt.u32.totalorder %s572_s29, %s949_s1 }
  0x14   : > { %p574_p13 = pneg %p782_p11 }
  0x16   : > { %p575_p0 = pnand %p574_p13, %p573_p12 }
  0x18   : > { %p576_p3 = pneg %p575_p0 }
  0x1a   : > { %p581_p7 = pnand %p579_p5, %p576_p3 }
  0x1c   : > { %584 = shalt.err (!%p581_p7)
}
  0x1d   : > { %s585_s7 = scalar_lea.vmem %s775_s22, 1024  ;;  %p593_p2 = scmp.lt.s32.totalorder %s775_s22, %s775_s22 }
  0x1e   : > { %p586_p9 = scmp.ne.s32.totalorder %s775_s22, %s585_s7  ;;  %p594_p6 = scmp.lt.s32.totalorder %s585_s7, %s585_s7 }
  0x20   : > { %p588_p10 = pnand %p586_p9, %p574_p13  ;;  %p595_p4 = por %p594_p6, %p593_p2 }
  0x22   : > { %p589_p1 = pneg %p588_p10 }
  0x24   : > { %p596_p8 = pnand %p595_p4, %p589_p1 }
  0x26   : > { %599 = shalt.err (!%p596_p8)
}
  0x27   : > { %s703_s8 = smov 64   ;;  %s704_s9 = smov 4  }
  0x28   : > { %511 = dma.hbm_to_vmem [thread:$0]  (!%p782_p11), %s949_s1, 1024, %s775_s22, [#allocation6], %s703_s8, %s703_s8, %s704_s9  }
  0x29   : > { %p25_p1 = scmp.eq.s32.totalorder %s24_s26, 0  ;;  %p34_p2 = scmp.ne.s32.totalorder %s696_s14, %s692_s13 }
  0x2a   : > { %p35_p4 = scmp.eq.s32.totalorder %s700_s15, 0  ;;  %p521_p6 = scmp.lt.s32.totalorder %s700_s15, 2 }
  0x2b   : > { %s821_s17 = scalar_select %p25_p1, %s696_s14, %s27_s25  }
  0x2c   : > { %p36_p8 = por %p35_p4, %p34_p2  ;;  %p959_p10 = scmp.eq.s32.totalorder %s752_s16, 1 }
  0x2d   : > { %s148_s23 = sand.u32 1, %s696_s14   ;;  %s462_s27 = sshll.u32 %s700_s15, 7 }
  0x2e   : > { %p825_p12 = por %p959_p10, %p34_p2  ;;  %s438_s28 = sshll.u32 %s148_s23, 3 }
  0x2f   : > { %s834_s4 = scalar_lea.hbm %s948_s0, %s462_s27  ;;  %s152_s22 = scalar_lea.vmem [#allocation2], %s438_s28 }
  0x30   : > { %s159_s25 = sshll.u32 %s152_s22, 4  ;;  %p836_p11 = pnand %p521_p6, %p36_p8  ;;  %s840_s25 = int_to_ptr.vmem [resolvable:$true] %s159_s25 }
  0x31   : > { %s842_s5 = scalar_lea.sflag [#allocation3], %s148_s23  ;;  %s600_s6 = scalar_lea.hbm %s834_s4, 128 }
  0x32   : > { %p601_p13 = scmp.ne.s32.totalorder %s834_s4, %s600_s6  ;;  %p602_p0 = pneg %p836_p11 }
  0x33   : > { %s605_s11 = scalar_lea.hbm %s948_s0, 256  ;;  %p606_p7 = scmp.lt.u32.totalorder %s834_s4, %s948_s0 }
  0x34   : > { %p603_p3 = pnand %p602_p0, %p601_p13  ;;  %p607_p9 = scmp.lt.u32.totalorder %s605_s11, %s600_s6 }
  0x35   : > { %p609_p2 = scmp.lt.u32.totalorder %s600_s6, %s834_s4 }
  0x36   : > { %p604_p5 = pneg %p603_p3  ;;  %p608_p1 = por %p607_p9, %p606_p7 }
  0x38   : > { %p610_p4 = por %p609_p2, %p608_p1 }
  0x3a   : > { %p611_p6 = pnand %p610_p4, %p604_p5 }
  0x3c   : > { %614 = shalt.err (!%p611_p6)
}
  0x3d   : > { %s615_s23 = scalar_lea.vmem %s840_s25, 128  ;;  %s705_s29 = smov [#allocation2]  }
  0x3e   : > { %p616_p8 = scmp.ne.s32.totalorder %s840_s25, %s615_s23  ;;  %s620_s30 = sshll.u32 %s705_s29, 4  ;;  %s621_s30 = int_to_ptr.vmem [resolvable:$false] %s620_s30 }
  0x3f   : > { %s622_s22 = scalar_lea.vmem %s621_s30, 256  ;;  %p623_p3 = scmp.lt.s32.totalorder %s840_s25, %s621_s30 }
  0x40   : > { %p618_p10 = pnand %p616_p8, %p602_p0  ;;  %p624_p7 = scmp.lt.s32.totalorder %s622_s22, %s615_s23 }
  0x42   : > { %p619_p13 = pneg %p618_p10  ;;  %p625_p9 = por %p624_p7, %p623_p3 }
  0x44   : > { %p626_p1 = pnand %p625_p9, %p619_p13 }
  0x46   : > { %629 = shalt.err (!%p626_p1)
}
  0x47   : > { %515 = dma.hbm_to_vmem [thread:$0]  (!%p836_p11), %s834_s4, 128, %s840_s25, %s842_s5, %s703_s8, %s703_s8, %s704_s9  }
  0x48   : > { %p962_p0 = scmp.ne.s32.totalorder %s957_s20, 0 }
  0x49   : > { %s876_s6 = sand.u32 (!%p962_p0), 1, %s692_s13   ;;  %p963_p5 = scmp.ne.s32.totalorder (!%p962_p0), %s955_s18, 0 }
  0x4a   : > { %171 = sbr.rel (%p962_p0) target bundleno = 351 (0x15f), region = 32  ;;  %s442_s7 = sshll.u32 (!%p962_p0), %s876_s6, 3 }
  0x4b   : > { %s174_s10 = scalar_lea.sflag (!%p962_p0), [#allocation3], %s876_s6  ;;  %s882_s26 = scalar_lea.vmem (!%p962_p0), [#allocation2], %s442_s7 }
  0x51   : > { %675 = dma.done.wait (%p963_p5), %s174_s10, 128  }
  0x52   : > { %677 = vsyncadd (%p963_p5), %s174_s10, 4294967168  ;;  %p964_p11 = scmp.eq.s32.totalorder %s752_s16, 0 }
  0x54   : > { %679 = dma.done.wait (%p964_p11), [#allocation6], 1024   ;;  %p965_p2 = pmov %p964_p11 }
  0x55   : > { %v706_v0 = vmov 0.0   ;;  %vm707_vm0 = vmmov 0   ;;  %v563_v1 = vld [vmem:[#allocation5] sm:$0xff]   ;;  %v564_v2 = vld [vmem:[#allocation5 + $0x8] sm:$0xff]   ;;  %v565_v3 = vld [vmem:[#allocation5 + $0x10] sm:$0xff]   ;;  %s203_s8 = scalar_lea.vmem [#allocation7], %s442_s7 }
  0x56   : > { %681 = vsyncadd (%p965_p2), [#allocation6], 4294966272  ;;  %480 = vmatprep.subr.bf16.mxu0 %v706_v0  ;;  %496 = vmatprep.mubr.msk.bf16.mxu0 %vm707_vm0, %v706_v0  ;;  %v566_v4 = vld [vmem:[#allocation5 + $0x18] sm:$0xff]   ;;  %v567_v5 = vld [vmem:[#allocation5 + $0x20] sm:$0xff]   ;;  %s351_s9 = sshll.u32 %s203_s8, 4  ;;  %s465_s4 = sshll.u32 %s752_s16, 7  ;;  %s899_s9 = int_to_ptr.vmem [resolvable:$true] %s351_s9 }
  0x57   : > { %481 = vmatpush3.bf16.msra.mxu0 %v563_v1  ;;  %v568_v6 = vld [vmem:[#allocation5 + $0x28] sm:$0xff]   ;;  %v569_v7 = vld [vmem:[#allocation5 + $0x30] sm:$0xff]   ;;  %v570_v8 = vld [vmem:[#allocation5 + $0x38] sm:$0xff]   ;;  %s904_s11 = scalar_lea.hbm %s951_s3, %s465_s4  ;;  %s338_s27 = scalar_lea.sflag [#allocation4], %s876_s6 }
  0x58   : > { %482 = vmatprep.subr.bf16.mxu0 %v706_v0  ;;  %v571_v9 = vld [vmem:[%s882_s26] sm:$0xff]   ;;  %s630_s28 = scalar_lea.vmem %s899_s9, 128  ;;  %s708_s16 = smov [#allocation7]  }
  0x59   : > { %v445_v10 = vld [vmem:[%s950_s2] ss:$0 sm:$0xff]  ;;  %p631_p4 = scmp.ne.s32.totalorder %s899_s9, %s630_s28  ;;  %s634_s23 = sshll.u32 %s708_s16, 4  ;;  %s635_s23 = int_to_ptr.vmem [resolvable:$false] %s634_s23 }
  0x5a   : > { %s636_s29 = scalar_lea.vmem %s635_s23, 256  ;;  %p637_p10 = scmp.lt.s32.totalorder %s899_s9, %s635_s23 }
  0x5b   : > { %483 = vmatpush3.bf16.msra.mxu0 %v564_v2  ;;  %p632_p6 = pnand %p631_p4, %p825_p12  ;;  %p638_p13 = scmp.lt.s32.totalorder %s636_s29, %s630_s28 }
  0x5c   : > { %484 = vmatprep.subr.bf16.mxu0 %v706_v0 }
  0x5d   : > { %p633_p8 = pneg %p632_p6  ;;  %p639_p3 = por %p638_p13, %p637_p10 }
  0x5f   : > { %485 = vmatpush3.bf16.msra.mxu0 %v565_v3  ;;  %p640_p7 = pnand %p639_p3, %p633_p8 }
  0x60   : > { %486 = vmatprep.subr.bf16.mxu0 %v706_v0 }
  0x63   : > { %487 = vmatpush3.bf16.msra.mxu0 %v566_v4 }
  0x64   : > { %488 = vmatprep.subr.bf16.mxu0 %v706_v0 }
  0x67   : > { %489 = vmatpush3.bf16.msra.mxu0 %v567_v5 }
  0x68   : > { %490 = vmatprep.subr.bf16.mxu0 %v706_v0 }
  0x6b   : > { %491 = vmatpush3.bf16.msra.mxu0 %v568_v6 }
  0x6c   : > { %492 = vmatprep.subr.bf16.mxu0 %v706_v0 }
  0x6f   : > { %493 = vmatpush3.bf16.msra.mxu0 %v569_v7 }
  0x70   : > { %494 = vmatprep.subr.bf16.mxu0 %v706_v0 }
  0x73   : > { %495 = vmatpush3.bf16.msra.mxu0 %v570_v8 }
  0x76   : > { %497 = vmatmul.mubr.bf16.vlgmr.msra.gmra.mrb[0].mxu0 %v571_v9 }
 0x149   : > { %v320_v11 = vpop.f32.mrb[0].mxu0 }
 0x14a   : > { %v498_v12 = vpop.f32.mrb[1].mxu0  ;;  %v321_v14 = vadd.f32 %v445_v10, %v320_v11 }
 0x14b   : > { %v323_v13 = vpop.f32.mrb[2].mxu0 }
 0x14c   : > { %v324_v15 = vadd.f32 %v445_v10, %v323_v13  ;;  %v499_v16 = vpop.f32.mrb[3].mxu0 }
 0x14e   : > { %v469_v17 = vpack.c.bf16 %v324_v15, %v321_v14 }
 0x150   : > { %470 = vst [vmem:[%s203_s8] sm:$0xff] %v469_v17  }
 0x151   : > { %643 = shalt.err (!%p640_p7)
}
 0x152   : > { %s644_s30 = scalar_lea.hbm %s904_s11, 128  ;;  %s648_s10 = scalar_lea.hbm %s951_s3, 256 }
 0x153   : > { %p645_p9 = scmp.ne.s32.totalorder %s904_s11, %s644_s30  ;;  %p649_p5 = scmp.lt.u32.totalorder %s904_s11, %s951_s3 }
 0x154   : > { %p650_p11 = scmp.lt.u32.totalorder %s648_s10, %s644_s30  ;;  %p652_p4 = scmp.lt.u32.totalorder %s644_s30, %s904_s11 }
 0x155   : > { %p646_p1 = pnand %p645_p9, %p825_p12 }
 0x156   : > { %p651_p2 = por %p650_p11, %p649_p5 }
 0x157   : > { %p647_p0 = pneg %p646_p1 }
 0x158   : > { %p653_p6 = por %p652_p4, %p651_p2 }
 0x15a   : > { %p654_p8 = pnand %p653_p6, %p647_p0 }
 0x15c   : > { %657 = shalt.err (!%p654_p8)
}
 0x15d   : > { %s709_s20 = smov 64   ;;  %s710_s8 = smov 4  }
 0x15e   : > { %506 = dma.vmem_to_hbm [thread:$0]  (%p825_p12), %s899_s9, 128, %s904_s11, %s338_s27, %s709_s20, %s709_s20, %s710_s8  }
 0x15f PF: > { %s366_s4 = sand.u32 1, %s688_s12   ;;  %p966_p10 = scmp.ne.s32.totalorder %s956_s19, 0 }
 0x160   : > { %p967_p13 = scmp.ge.s32.totalorder %s700_s15, 2  ;;  %s367_s25 = scalar_lea.sflag [#allocation4], %s366_s4 }
 0x162   : > { %p517_p3 = pnand %p967_p13, %p966_p10 }
 0x164   : > { %683 = dma.done.wait (!%p517_p3), %s367_s25, 128  }
 0x165   : > { %685 = vsyncadd (!%p517_p3), %s367_s25, 4294967168  ;;  %p17_p7 = scmp.ge.s32.totalorder %s787_s24, 4   ;;  %s968_s12 = smov %s692_s13 }
 0x166   : > { %s969_s13 = smov %s696_s14  ;;  %s970_s14 = smov %s821_s17 }
 0x167   : > { %s971_s15 = smov %s787_s24  ;;  %19 = sbr.rel (!%p17_p7) target bundleno = 6 (0x6), region = 81 }
 0x16e   :  { %372 = vsyncpa [#allocation3], 1 }
 0x16f   :  { %374 = vsyncpa [#allocation3 + $0x1], 1 }
 0x170   :  { %375 = vsyncpa [#allocation6], 1 }
 0x171   :  { %376 = vsyncpa [#allocation4], 1 }
 0x172   :  { %378 = vsyncpa [#allocation4 + $0x1], 1 }

// kernel: tpu_custom_call.1
= control target key start
LH: loop header
LB: loop body
LE: loop exit
PB: predicated region body
PF: predicated region fallthrough
CT: control target
= control target key end

     0   :  { %8 = vsyncpa [#allocation3], 0  ;;  %s948_s0 = inlined_call_operand.hbm [shape: bf16[32,128], index: 0, kind: input, shape index: {}]   ;;  %s949_s1 = inlined_call_operand.hbm [shape: bf16[128,128], index: 1, kind: input, shape index: {}]   ;;  %s950_s2 = inlined_call_operand.vmem [shape: f32[1,128], index: 2, kind: input, shape index: {}]   ;;  %s951_s3 = inlined_call_operand.hbm [shape: bf16[32,128], index: 3, kind: output, shape index: {}]  }
   0x1   :  { %10 = vsyncpa [#allocation3 + $0x1], 0 }
   0x2   :  { %11 = vsyncpa [#allocation6], 0 }
   0x3   :  { %12 = vsyncpa [#allocation4], 0 }
   0x4   :  { %14 = vsyncpa [#allocation4 + $0x1], 0  ;;  %s731_s12 = smov 0   ;;  %s733_s13 = smov 0  }
   0x5   :  { %s735_s14 = smov 0   ;;  %s737_s15 = smov 0  }
   0x6 LB: > { %s752_s16 = sadd.s32 4294967295, %s700_s15   ;;  %s434_s17 = sadd.s32 4294967294, %s700_s15   ;;  %s700_s15 = sphi %s737_s15, %s971_s15   ;;  %s696_s14 = sphi %s735_s14, %s970_s14   ;;  %s692_s13 = sphi %s733_s13, %s969_s13   ;;  %s688_s12 = sphi %s731_s12, %s968_s12  }
   0x7   : > { %p40_p0 = scmp.ne.s32.totalorder %s692_s13, %s688_s12  ;;  %p952_p1 = scmp.eq.s32.totalorder %s752_s16, 0 }
   0x8   : > { %p112_p3 = scmp.eq.s32.totalorder %s434_s17, 1  ;;  %p435_p5 = scmp.ge.s32.totalorder %s700_s15, 1 }
   0x9   : > { %p761_p4 = por %p952_p1, %p40_p0  ;;  %p119_p7 = scmp.lt.s32.totalorder %s700_s15, 3 }
   0xa   : > { %p766_p6 = por %p112_p3, %p40_p0  ;;  %s702_s21 = smov [#allocation5]  }
   0xb   : > { %s955_s18 = scalar_select %p761_p4, 1, 0 }
   0xc   : > { %s956_s19 = scalar_select %p766_p6, 1, 0 }
   0xd   : > { %p771_p8 = pnand %p435_p5, %p119_p7  ;;  %s131_s22 = sshll.u32 %s702_s21, 4  ;;  %s775_s22 = int_to_ptr.vmem [resolvable:$true] %s131_s22 }
   0xe   : > { %s787_s24 = sadd.s32 1, %s700_s15   ;;  %s27_s25 = sadd.s32 1, %s696_s14 }
   0xf   : > { %s957_s20 = scalar_select %p771_p8, 1, 0 }
  0x10   : > { %p508_p9 = pneg %p771_p8  ;;  %s24_s26 = ssub.s32 %s700_s15, %s787_s24 }
  0x11   : > { %s572_s29 = scalar_lea.hbm %s949_s1, 1024 }
  0x12   : > { %p782_p11 = pnand %p508_p9, %p952_p1  ;;  %p573_p12 = scmp.ne.s32.totalorder %s949_s1, %s572_s29 }
  0x13   : > { %p579_p5 = scmp.lt.u32.totalorder %s572_s29, %s949_s1 }
  0x14   : > { %p574_p13 = pneg %p782_p11 }
  0x16   : > { %p575_p0 = pnand %p574_p13, %p573_p12 }
  0x18   : > { %p576_p3 = pneg %p575_p0 }
  0x1a   : > { %p581_p7 = pnand %p579_p5, %p576_p3 }
  0x1c   : > { %584 = shalt.err (!%p581_p7)
}
  0x1d   : > { %s585_s7 = scalar_lea.vmem %s775_s22, 1024  ;;  %p593_p2 = scmp.lt.s32.totalorder %s775_s22, %s775_s22 }
  0x1e   : > { %p586_p9 = scmp.ne.s32.totalorder %s775_s22, %s585_s7  ;;  %p594_p6 = scmp.lt.s32.totalorder %s585_s7, %s585_s7 }
  0x20   : > { %p588_p10 = pnand %p586_p9, %p574_p13  ;;  %p595_p4 = por %p594_p6, %p593_p2 }
  0x22   : > { %p589_p1 = pneg %p588_p10 }
  0x24   : > { %p596_p8 = pnand %p595_p4, %p589_p1 }
  0x26   : > { %599 = shalt.err (!%p596_p8)
}
  0x27   : > { %s703_s8 = smov 64   ;;  %s704_s9 = smov 4  }
  0x28   : > { %511 = dma.hbm_to_vmem [thread:$0]  (!%p782_p11), %s949_s1, 1024, %s775_s22, [#allocation6], %s703_s8, %s703_s8, %s704_s9  }
  0x29   : > { %p25_p1 = scmp.eq.s32.totalorder %s24_s26, 0  ;;  %p34_p2 = scmp.ne.s32.totalorder %s696_s14, %s692_s13 }
  0x2a   : > { %p35_p4 = scmp.eq.s32.totalorder %s700_s15, 0  ;;  %p521_p6 = scmp.lt.s32.totalorder %s700_s15, 2 }
  0x2b   : > { %s821_s17 = scalar_select %p25_p1, %s696_s14, %s27_s25  }
  0x2c   : > { %p36_p8 = por %p35_p4, %p34_p2  ;;  %p959_p10 = scmp.eq.s32.totalorder %s752_s16, 1 }
  0x2d   : > { %s148_s23 = sand.u32 1, %s696_s14   ;;  %s462_s27 = sshll.u32 %s700_s15, 7 }
  0x2e   : > { %p825_p12 = por %p959_p10, %p34_p2  ;;  %s438_s28 = sshll.u32 %s148_s23, 3 }
  0x2f   : > { %s834_s4 = scalar_lea.hbm %s948_s0, %s462_s27  ;;  %s152_s22 = scalar_lea.vmem [#allocation2], %s438_s28 }
  0x30   : > { %s159_s25 = sshll.u32 %s152_s22, 4  ;;  %p836_p11 = pnand %p521_p6, %p36_p8  ;;  %s840_s25 = int_to_ptr.vmem [resolvable:$true] %s159_s25 }
  0x31   : > { %s842_s5 = scalar_lea.sflag [#allocation3], %s148_s23  ;;  %s600_s6 = scalar_lea.hbm %s834_s4, 128 }
  0x32   : > { %p601_p13 = scmp.ne.s32.totalorder %s834_s4, %s600_s6  ;;  %p602_p0 = pneg %p836_p11 }
  0x33   : > { %s605_s11 = scalar_lea.hbm %s948_s0, 256  ;;  %p606_p7 = scmp.lt.u32.totalorder %s834_s4, %s948_s0 }
  0x34   : > { %p603_p3 = pnand %p602_p0, %p601_p13  ;;  %p607_p9 = scmp.lt.u32.totalorder %s605_s11, %s600_s6 }
  0x35   : > { %p609_p2 = scmp.lt.u32.totalorder %s600_s6, %s834_s4 }
  0x36   : > { %p604_p5 = pneg %p603_p3  ;;  %p608_p1 = por %p607_p9, %p606_p7 }
  0x38   : > { %p610_p4 = por %p609_p2, %p608_p1 }
  0x3a   : > { %p611_p6 = pnand %p610_p4, %p604_p5 }
  0x3c   : > { %614 = shalt.err (!%p611_p6)
}
  0x3d   : > { %s615_s23 = scalar_lea.vmem %s840_s25, 128  ;;  %s705_s29 = smov [#allocation2]  }
  0x3e   : > { %p616_p8 = scmp.ne.s32.totalorder %s840_s25, %s615_s23  ;;  %s620_s30 = sshll.u32 %s705_s29, 4  ;;  %s621_s30 = int_to_ptr.vmem [resolvable:$false] %s620_s30 }
  0x3f   : > { %s622_s22 = scalar_lea.vmem %s621_s30, 256  ;;  %p623_p3 = scmp.lt.s32.totalorder %s840_s25, %s621_s30 }
  0x40   : > { %p618_p10 = pnand %p616_p8, %p602_p0  ;;  %p624_p7 = scmp.lt.s32.totalorder %s622_s22, %s615_s23 }
  0x42   : > { %p619_p13 = pneg %p618_p10  ;;  %p625_p9 = por %p624_p7, %p623_p3 }
  0x44   : > { %p626_p1 = pnand %p625_p9, %p619_p13 }
  0x46   : > { %629 = shalt.err (!%p626_p1)
}
  0x47   : > { %515 = dma.hbm_to_vmem [thread:$0]  (!%p836_p11), %s834_s4, 128, %s840_s25, %s842_s5, %s703_s8, %s703_s8, %s704_s9  }
  0x48   : > { %p962_p0 = scmp.ne.s32.totalorder %s957_s20, 0 }
  0x49   : > { %s876_s6 = sand.u32 (!%p962_p0), 1, %s692_s13   ;;  %p963_p5 = scmp.ne.s32.totalorder (!%p962_p0), %s955_s18, 0 }
  0x4a   : > { %171 = sbr.rel (%p962_p0) target bundleno = 351 (0x15f), region = 32  ;;  %s442_s7 = sshll.u32 (!%p962_p0), %s876_s6, 3 }
  0x4b   : > { %s174_s10 = scalar_lea.sflag (!%p962_p0), [#allocation3], %s876_s6  ;;  %s882_s26 = scalar_lea.vmem (!%p962_p0), [#allocation2], %s442_s7 }
  0x51   : > { %675 = dma.done.wait (%p963_p5), %s174_s10, 128  }
  0x52   : > { %677 = vsyncadd (%p963_p5), %s174_s10, 4294967168  ;;  %p964_p11 = scmp.eq.s32.totalorder %s752_s16, 0 }
  0x54   : > { %679 = dma.done.wait (%p964_p11), [#allocation6], 1024   ;;  %p965_p2 = pmov %p964_p11 }
  0x55   : > { %v706_v0 = vmov 0.0   ;;  %vm707_vm0 = vmmov 0   ;;  %v563_v1 = vld [vmem:[#allocation5] sm:$0xff]   ;;  %v564_v2 = vld [vmem:[#allocation5 + $0x8] sm:$0xff]   ;;  %v565_v3 = vld [vmem:[#allocation5 + $0x10] sm:$0xff]   ;;  %s203_s8 = scalar_lea.vmem [#allocation7], %s442_s7 }
  0x56   : > { %681 = vsyncadd (%p965_p2), [#allocation6], 4294966272  ;;  %480 = vmatprep.subr.bf16.mxu0 %v706_v0  ;;  %496 = vmatprep.mubr.msk.bf16.mxu0 %vm707_vm0, %v706_v0  ;;  %v566_v4 = vld [vmem:[#allocation5 + $0x18] sm:$0xff]   ;;  %v567_v5 = vld [vmem:[#allocation5 + $0x20] sm:$0xff]   ;;  %s351_s9 = sshll.u32 %s203_s8, 4  ;;  %s465_s4 = sshll.u32 %s752_s16, 7  ;;  %s899_s9 = int_to_ptr.vmem [resolvable:$true] %s351_s9 }
  0x57   : > { %481 = vmatpush3.bf16.msra.mxu0 %v563_v1  ;;  %v568_v6 = vld [vmem:[#allocation5 + $0x28] sm:$0xff]   ;;  %v569_v7 = vld [vmem:[#allocation5 + $0x30] sm:$0xff]   ;;  %v570_v8 = vld [vmem:[#allocation5 + $0x38] sm:$0xff]   ;;  %s904_s11 = scalar_lea.hbm %s951_s3, %s465_s4  ;;  %s338_s27 = scalar_lea.sflag [#allocation4], %s876_s6 }
  0x58   : > { %482 = vmatprep.subr.bf16.mxu0 %v706_v0  ;;  %v571_v9 = vld [vmem:[%s882_s26] sm:$0xff]   ;;  %s630_s28 = scalar_lea.vmem %s899_s9, 128  ;;  %s708_s16 = smov [#allocation7]  }
  0x59   : > { %v445_v10 = vld [vmem:[%s950_s2] ss:$0 sm:$0xff]  ;;  %p631_p4 = scmp.ne.s32.totalorder %s899_s9, %s630_s28  ;;  %s634_s23 = sshll.u32 %s708_s16, 4  ;;  %s635_s23 = int_to_ptr.vmem [resolvable:$false] %s634_s23 }
  0x5a   : > { %s636_s29 = scalar_lea.vmem %s635_s23, 256  ;;  %p637_p10 = scmp.lt.s32.totalorder %s899_s9, %s635_s23 }
  0x5b   : > { %483 = vmatpush3.bf16.msra.mxu0 %v564_v2  ;;  %p632_p6 = pnand %p631_p4, %p825_p12  ;;  %p638_p13 = scmp.lt.s32.totalorder %s636_s29, %s630_s28 }
  0x5c   : > { %484 = vmatprep.subr.bf16.mxu0 %v706_v0 }
  0x5d   : > { %p633_p8 = pneg %p632_p6  ;;  %p639_p3 = por %p638_p13, %p637_p10 }
  0x5f   : > { %485 = vmatpush3.bf16.msra.mxu0 %v565_v3  ;;  %p640_p7 = pnand %p639_p3, %p633_p8 }
  0x60   : > { %486 = vmatprep.subr.bf16.mxu0 %v706_v0 }
  0x63   : > { %487 = vmatpush3.bf16.msra.mxu0 %v566_v4 }
  0x64   : > { %488 = vmatprep.subr.bf16.mxu0 %v706_v0 }
  0x67   : > { %489 = vmatpush3.bf16.msra.mxu0 %v567_v5 }
  0x68   : > { %490 = vmatprep.subr.bf16.mxu0 %v706_v0 }
  0x6b   : > { %491 = vmatpush3.bf16.msra.mxu0 %v568_v6 }
  0x6c   : > { %492 = vmatprep.subr.bf16.mxu0 %v706_v0 }
  0x6f   : > { %493 = vmatpush3.bf16.msra.mxu0 %v569_v7 }
  0x70   : > { %494 = vmatprep.subr.bf16.mxu0 %v706_v0 }
  0x73   : > { %495 = vmatpush3.bf16.msra.mxu0 %v570_v8 }
  0x76   : > { %497 = vmatmul.mubr.bf16.vlgmr.msra.gmra.mrb[0].mxu0 %v571_v9 }
 0x149   : > { %v320_v11 = vpop.f32.mrb[0].mxu0 }
 0x14a   : > { %v498_v12 = vpop.f32.mrb[1].mxu0  ;;  %v321_v14 = vadd.f32 %v445_v10, %v320_v11 }
 0x14b   : > { %v323_v13 = vpop.f32.mrb[2].mxu0 }
 0x14c   : > { %v324_v15 = vadd.f32 %v445_v10, %v323_v13  ;;  %v499_v16 = vpop.f32.mrb[3].mxu0 }
 0x14e   : > { %v469_v17 = vpack.c.bf16 %v324_v15, %v321_v14 }
 0x150   : > { %470 = vst [vmem:[%s203_s8] sm:$0xff] %v469_v17  }
 0x151   : > { %643 = shalt.err (!%p640_p7)
}
 0x152   : > { %s644_s30 = scalar_lea.hbm %s904_s11, 128  ;;  %s648_s10 = scalar_lea.hbm %s951_s3, 256 }
 0x153   : > { %p645_p9 = scmp.ne.s32.totalorder %s904_s11, %s644_s30  ;;  %p649_p5 = scmp.lt.u32.totalorder %s904_s11, %s951_s3 }
 0x154   : > { %p650_p11 = scmp.lt.u32.totalorder %s648_s10, %s644_s30  ;;  %p652_p4 = scmp.lt.u32.totalorder %s644_s30, %s904_s11 }
 0x155   : > { %p646_p1 = pnand %p645_p9, %p825_p12 }
 0x156   : > { %p651_p2 = por %p650_p11, %p649_p5 }
 0x157   : > { %p647_p0 = pneg %p646_p1 }
 0x158   : > { %p653_p6 = por %p652_p4, %p651_p2 }
 0x15a   : > { %p654_p8 = pnand %p653_p6, %p647_p0 }
 0x15c   : > { %657 = shalt.err (!%p654_p8)
}
 0x15d   : > { %s709_s20 = smov 64   ;;  %s710_s8 = smov 4  }
 0x15e   : > { %506 = dma.vmem_to_hbm [thread:$0]  (%p825_p12), %s899_s9, 128, %s904_s11, %s338_s27, %s709_s20, %s709_s20, %s710_s8  }
 0x15f PF: > { %s366_s4 = sand.u32 1, %s688_s12   ;;  %p966_p10 = scmp.ne.s32.totalorder %s956_s19, 0 }
 0x160   : > { %p967_p13 = scmp.ge.s32.totalorder %s700_s15, 2  ;;  %s367_s25 = scalar_lea.sflag [#allocation4], %s366_s4 }
 0x162   : > { %p517_p3 = pnand %p967_p13, %p966_p10 }
 0x164   : > { %683 = dma.done.wait (!%p517_p3), %s367_s25, 128  }
 0x165   : > { %685 = vsyncadd (!%p517_p3), %s367_s25, 4294967168  ;;  %p17_p7 = scmp.ge.s32.totalorder %s787_s24, 4   ;;  %s968_s12 = smov %s692_s13 }
 0x166   : > { %s969_s13 = smov %s696_s14  ;;  %s970_s14 = smov %s821_s17 }
 0x167   : > { %s971_s15 = smov %s787_s24  ;;  %19 = sbr.rel (!%p17_p7) target bundleno = 6 (0x6), region = 81 }
 0x16e   :  { %372 = vsyncpa [#allocation3], 1 }
 0x16f   :  { %374 = vsyncpa [#allocation3 + $0x1], 1 }
 0x170   :  { %375 = vsyncpa [#allocation6], 1 }
 0x171   :  { %376 = vsyncpa [#allocation4], 1 }
 0x172   :  { %378 = vsyncpa [#allocation4 + $0x1], 1 }

</bundles_post_ra>
